<compile_context>
chip_gen: v6e
topology: v6e:2x2x1
jax: 0.10.0
libtpu: 0.0.40
codegen_flags: <defaults>
</compile_context>

<pallas_src>
import jax
import jax.numpy as jnp
from jax.experimental import pallas as pl
from jax.experimental.pallas import tpu as pltpu

IN_F = 1000
HID_F = 500
OUT_F = 2

K_PAD = 1024  # IN_F rounded up to a multiple of 128 (lane width)


def _round_up(n: int, m: int) -> int:
    return ((n + m - 1) // m) * m


def _affine_kernel(x_ref, w_ref, b_ref, o_ref):
    # One MXU matmul per batch tile: [TM, 1024] @ [1024, 2] + [1, 2].
    o_ref[...] = (
        jnp.dot(x_ref[...], w_ref[...], preferred_element_type=jnp.float32)
        + b_ref[...]
    ).astype(o_ref.dtype)


def fully_connected_forward(x, w1, b1, w2, b2):
    """Eval-mode forward of FullyConnected.

    x:  [B, 1000] f32
    w1: [1000, 500] (pre-transposed torch fc1.weight), b1: [500]
    w2: [500, 2]    (pre-transposed torch fc2.weight), b2: [2]
    returns [B, 2] f32
    """
    B = x.shape[0]

    # --- collapse the affine stack (exact: dropout == identity in eval, and
    #     there is no nonlinearity between fc1 and fc2) ----------------------
    w = jnp.dot(w1, w2, precision=jax.lax.Precision.HIGHEST)            # [1000, 2]
    b = jnp.dot(b1, w2, precision=jax.lax.Precision.HIGHEST) + b2       # [2]

    # --- pad to TPU-friendly shapes -----------------------------------------
    # Batch tile: 256 rows when the batch is large, else one (8-aligned) tile.
    tm = 256 if B >= 256 else _round_up(B, 8)
    b_padded = _round_up(B, tm)

    x_p = jnp.pad(x, ((0, b_padded - B), (0, K_PAD - IN_F)))            # [Bp, 1024]
    w_p = jnp.pad(w, ((0, K_PAD - IN_F), (0, 0)))                       # [1024, 2]
    b_2d = b.reshape(1, OUT_F)                                          # [1, 2]

    grid = (b_padded // tm,)

    out = pl.pallas_call(
        _affine_kernel,
        out_shape=jax.ShapeDtypeStruct((b_padded, OUT_F), x.dtype),
        grid=grid,
        in_specs=[
            # x: one batch tile per grid step (double-buffered / pipelined)
            pl.BlockSpec((tm, K_PAD), lambda i: (i, 0)),
            # fused weight + bias: constant block index -> fetched once,
            # VMEM-resident across all batch tiles
            pl.BlockSpec((K_PAD, OUT_F), lambda i: (0, 0)),
            pl.BlockSpec((1, OUT_F), lambda i: (0, 0)),
        ],
        out_specs=pl.BlockSpec((tm, OUT_F), lambda i: (i, 0)),
        compiler_params=pltpu.CompilerParams(
            # batch tiles are independent -> shard across TensorCores (v7x)
            dimension_semantics=("parallel",),
        ),
    )(x_p, w_p, b_2d)

    return out[:B]


def _init_linear(key, fan_in, fan_out):
    # Mirrors torch.nn.Linear default init: U(-1/sqrt(fan_in), 1/sqrt(fan_in)).
    kw, kb = jax.random.split(key)
    bound = 1.0 / jnp.sqrt(jnp.asarray(fan_in, jnp.float32))
    # stored as [in, out] (transpose of torch's [out, in]) so the math is x @ W
    w = jax.random.uniform(kw, (fan_in, fan_out), jnp.float32, -bound, bound)
    b = jax.random.uniform(kb, (fan_out,), jnp.float32, -bound, bound)
    return w, b


if __name__ == "__main__":
    root = jax.random.PRNGKey(0)
    k_x1, k_x2, k_fc1, k_fc2 = jax.random.split(root, 4)

    w1, b1 = _init_linear(k_fc1, IN_F, HID_F)
    w2, b2 = _init_linear(k_fc2, HID_F, OUT_F)

    def reference(x):
        # plain-JAX eval-mode forward: dropout(x) = x, no activation
        h = jnp.dot(x, w1, precision=jax.lax.Precision.HIGHEST) + b1
        return jnp.dot(h, w2, precision=jax.lax.Precision.HIGHEST) + b2

    ok = True
    # batch=8: single small tile; batch=300: exercises batch padding + 2 tiles
    for batch, key in ((8, k_x1), (300, k_x2)):
        x = jax.random.normal(key, (batch, IN_F), jnp.float32)
        out = jax.block_until_ready(fully_connected_forward(x, w1, b1, w2, b2))
        ref = reference(x)
        ok &= out.shape == (batch, OUT_F)
        ok &= bool(jnp.allclose(out, ref, atol=1e-3, rtol=1e-3))

    assert ok
    print("KERNEL_OK")
</pallas_src>

<mosaic_0001>
module attributes {stable_mosaic.version = 11 : i64} {
  func.func @_affine_kernel(%arg0: i32, %arg1: memref<8x1024xf32, #tpu.memory_space<vmem>>, %arg2: memref<1024x2xf32, #tpu.memory_space<vmem>>, %arg3: memref<1x2xf32, #tpu.memory_space<vmem>>, %arg4: memref<8x2xf32, #tpu.memory_space<vmem>>) attributes {dimension_semantics = [#tpu.dimension_semantics<parallel>], iteration_bounds = array<i64: 1>, scalar_prefetch = 0 : i64, scratch_operands = 0 : i64, tpu.core_type = #tpu.core_type<tc>, window_params = [{transform_indices = @transform_0, window_bounds = array<i64: 8, 1024>}, {pipeline_mode = #tpu.pipeline_mode<synchronous>, transform_indices = @transform_1, window_bounds = array<i64: 1024, 2>}, {pipeline_mode = #tpu.pipeline_mode<synchronous>, transform_indices = @transform_2, window_bounds = array<i64: 1, 2>}, {transform_indices = @transform_3, window_bounds = array<i64: 8, 2>}]} {
    %c0 = arith.constant 0 : index
    %c0_0 = arith.constant 0 : index
    %0 = vector.load %arg1[%c0, %c0_0] : memref<8x1024xf32, #tpu.memory_space<vmem>>, vector<8x1024xf32>
    %c0_1 = arith.constant 0 : index
    %c0_2 = arith.constant 0 : index
    %1 = vector.load %arg2[%c0_1, %c0_2] : memref<1024x2xf32, #tpu.memory_space<vmem>>, vector<1024x2xf32>
    %cst = arith.constant dense<0.000000e+00> : vector<8x2xf32>
    %2 = tpu.matmul %0, %1, %cst {dimension_numbers = #tpu.dot_dimension_numbers<[1], [0], [0], [1], [0, 0, 1, 1], [], []>} : vector<8x1024xf32>, vector<1024x2xf32>, vector<8x2xf32> -> vector<8x2xf32>
    %c0_3 = arith.constant 0 : index
    %c0_4 = arith.constant 0 : index
    %3 = vector.load %arg3[%c0_3, %c0_4] : memref<1x2xf32, #tpu.memory_space<vmem>>, vector<1x2xf32>
    %4 = vector.broadcast %3 : vector<1x2xf32> to vector<8x2xf32>
    %5 = arith.addf %2, %4 : vector<8x2xf32>
    %c0_5 = arith.constant 0 : index
    %c0_6 = arith.constant 0 : index
    %6 = vector.load %arg4[%c0_5, %c0_6] : memref<8x2xf32, #tpu.memory_space<vmem>>, vector<8x2xf32>
    tpu.vector_store %arg4[%c0_5, %c0_6], %5 {strides = array<i32>} : memref<8x2xf32, #tpu.memory_space<vmem>>, vector<8x2xf32>,
    return
  }
  func.func @transform_0(%arg0: i32) -> (i32, i32) {
    %c0_i32 = arith.constant 0 : i32
    %c0_i32_0 = arith.constant 0 : i32
    return %arg0, %c0_i32 : i32, i32
  }
  func.func @transform_1(%arg0: i32) -> (i32, i32) {
    %c0_i32 = arith.constant 0 : i32
    %c0_i32_0 = arith.constant 0 : i32
    %c0_i32_1 = arith.constant 0 : i32
    return %c0_i32, %c0_i32_0 : i32, i32
  }
  func.func @transform_2(%arg0: i32) -> (i32, i32) {
    %c0_i32 = arith.constant 0 : i32
    %c0_i32_0 = arith.constant 0 : i32
    %c0_i32_1 = arith.constant 0 : i32
    return %c0_i32, %c0_i32_0 : i32, i32
  }
  func.func @transform_3(%arg0: i32) -> (i32, i32) {
    %c0_i32 = arith.constant 0 : i32
    %c0_i32_0 = arith.constant 0 : i32
    return %arg0, %c0_i32 : i32, i32
  }
}

</mosaic_0001>

<bundles_post_ra>
// kernel: tpu_custom_call.1
= control target key start
LH: loop header
LB: loop body
LE: loop exit
PB: predicated region body
PF: predicated region fallthrough
CT: control target
= control target key end

     0   :  { %vm437_vm0 = vcmask 15360   ;;  %s1018_s1 = inlined_call_operand.vmem [shape: f32[1024,2], index: 1, kind: input, shape index: {}]   ;;  %s1019_s0 = inlined_call_operand.vmem [shape: f32[8,1024], index: 0, kind: input, shape index: {}]   ;;  %s1020_s2 = inlined_call_operand.vmem [shape: f32[1,2], index: 2, kind: input, shape index: {}]   ;;  %s1021_s3 = inlined_call_operand.vmem [shape: f32[8,2], index: 3, kind: output, shape index: {}]  }
   0x1   :  { %v53_v0 = vld [vmem:[%s1018_s1 + $0xf8] sm:$0xff]  ;;  %v52_v4 = vld [vmem:[%s1018_s1 + $0xf0] sm:$0xff]  ;;  %v51_v8 = vld [vmem:[%s1018_s1 + $0xe8] sm:$0xff] }
   0x2   :  { %v85_v1 = vld [vmem:[%s1018_s1 + $0x1f8] sm:$0xff]  ;;  %444 = vmatprep.subr.mxu0 %v53_v0  ;;  %v84_v5 = vld [vmem:[%s1018_s1 + $0x1f0] sm:$0xff]  ;;  %v83_v9 = vld [vmem:[%s1018_s1 + $0x1e8] sm:$0xff] }
   0x3   :  { %v37_v2 = vld [vmem:[%s1018_s1 + $0x78] sm:$0xff]  ;;  %479 = vmatprep.subr.mxu1 %v85_v1  ;;  %v36_v6 = vld [vmem:[%s1018_s1 + $0x70] sm:$0xff]  ;;  %v35_v10 = vld [vmem:[%s1018_s1 + $0x68] sm:$0xff] }
   0x4   :  { %v69_v3 = vld [vmem:[%s1018_s1 + $0x178] sm:$0xff]  ;;  %445 = vmatpush3.msra.mxu0 %v37_v2  ;;  %v68_v7 = vld [vmem:[%s1018_s1 + $0x170] sm:$0xff]  ;;  %v67_v11 = vld [vmem:[%s1018_s1 + $0x168] sm:$0xff] }
   0x5   :  { %480 = vmatpush3.msra.mxu1 %v69_v3  ;;  %446 = vmatprep.subr.mxu0 %v52_v4  ;;  %v50_v12 = vld [vmem:[%s1018_s1 + $0xe0] sm:$0xff]  ;;  %v49_v16 = vld [vmem:[%s1018_s1 + $0xd8] sm:$0xff]  ;;  %v48_v20 = vld [vmem:[%s1018_s1 + $0xd0] sm:$0xff] }
   0x6   :  { %481 = vmatprep.subr.mxu1 %v84_v5  ;;  %447 = vmatpush3.msra.mxu0 %v36_v6  ;;  %v82_v13 = vld [vmem:[%s1018_s1 + $0x1e0] sm:$0xff]  ;;  %v81_v17 = vld [vmem:[%s1018_s1 + $0x1d8] sm:$0xff]  ;;  %v80_v21 = vld [vmem:[%s1018_s1 + $0x1d0] sm:$0xff] }
   0x7   :  { %482 = vmatpush3.msra.mxu1 %v68_v7  ;;  %448 = vmatprep.subr.mxu0 %v51_v8  ;;  %v34_v14 = vld [vmem:[%s1018_s1 + $0x60] sm:$0xff]  ;;  %v33_v18 = vld [vmem:[%s1018_s1 + $0x58] sm:$0xff]  ;;  %v32_v22 = vld [vmem:[%s1018_s1 + $0x50] sm:$0xff] }
   0x8   :  { %483 = vmatprep.subr.mxu1 %v83_v9  ;;  %v66_v15 = vld [vmem:[%s1018_s1 + $0x160] sm:$0xff]  ;;  %449 = vmatpush3.msra.mxu0 %v35_v10  ;;  %v65_v19 = vld [vmem:[%s1018_s1 + $0x158] sm:$0xff]  ;;  %v64_v23 = vld [vmem:[%s1018_s1 + $0x150] sm:$0xff] }
   0x9   :  { %484 = vmatpush3.msra.mxu1 %v67_v11  ;;  %450 = vmatprep.subr.mxu0 %v50_v12  ;;  %v47_v24 = vld [vmem:[%s1018_s1 + $0xc8] sm:$0xff]  ;;  %v46_v28 = vld [vmem:[%s1018_s1 + $0xc0] sm:$0xff]  ;;  %v45_v32 = vld [vmem:[%s1018_s1 + $0xb8] sm:$0xff] }
   0xa   :  { %485 = vmatprep.subr.mxu1 %v82_v13  ;;  %451 = vmatpush3.msra.mxu0 %v34_v14  ;;  %v79_v25 = vld [vmem:[%s1018_s1 + $0x1c8] sm:$0xff]  ;;  %v78_v29 = vld [vmem:[%s1018_s1 + $0x1c0] sm:$0xff]  ;;  %v77_v33 = vld [vmem:[%s1018_s1 + $0x1b8] sm:$0xff] }
   0xb   :  { %486 = vmatpush3.msra.mxu1 %v66_v15  ;;  %452 = vmatprep.subr.mxu0 %v49_v16  ;;  %v31_v26 = vld [vmem:[%s1018_s1 + $0x48] sm:$0xff]  ;;  %v30_v30 = vld [vmem:[%s1018_s1 + $0x40] sm:$0xff]  ;;  %v29_v34 = vld [vmem:[%s1018_s1 + $0x38] sm:$0xff] }
   0xc   :  { %487 = vmatprep.subr.mxu1 %v81_v17  ;;  %453 = vmatpush3.msra.mxu0 %v33_v18  ;;  %v63_v27 = vld [vmem:[%s1018_s1 + $0x148] sm:$0xff]  ;;  %v62_v31 = vld [vmem:[%s1018_s1 + $0x140] sm:$0xff]  ;;  %v61_v35 = vld [vmem:[%s1018_s1 + $0x138] sm:$0xff] }
   0xd   :  { %488 = vmatpush3.msra.mxu1 %v65_v19  ;;  %454 = vmatprep.subr.mxu0 %v48_v20  ;;  %v44_v36 = vld [vmem:[%s1018_s1 + $0xb0] sm:$0xff]  ;;  %v43_v40 = vld [vmem:[%s1018_s1 + $0xa8] sm:$0xff]  ;;  %v42_v44 = vld [vmem:[%s1018_s1 + $0xa0] sm:$0xff] }
   0xe   :  { %489 = vmatprep.subr.mxu1 %v80_v21  ;;  %455 = vmatpush3.msra.mxu0 %v32_v22  ;;  %v76_v37 = vld [vmem:[%s1018_s1 + $0x1b0] sm:$0xff]  ;;  %v75_v41 = vld [vmem:[%s1018_s1 + $0x1a8] sm:$0xff]  ;;  %v74_v45 = vld [vmem:[%s1018_s1 + $0x1a0] sm:$0xff] }
   0xf   :  { %490 = vmatpush3.msra.mxu1 %v64_v23  ;;  %456 = vmatprep.subr.mxu0 %v47_v24  ;;  %v28_v38 = vld [vmem:[%s1018_s1 + $0x30] sm:$0xff]  ;;  %v27_v42 = vld [vmem:[%s1018_s1 + $0x28] sm:$0xff]  ;;  %v26_v46 = vld [vmem:[%s1018_s1 + $0x20] sm:$0xff] }
  0x10   :  { %491 = vmatprep.subr.mxu1 %v79_v25  ;;  %457 = vmatpush3.msra.mxu0 %v31_v26  ;;  %v60_v39 = vld [vmem:[%s1018_s1 + $0x130] sm:$0xff]  ;;  %v59_v43 = vld [vmem:[%s1018_s1 + $0x128] sm:$0xff]  ;;  %v58_v47 = vld [vmem:[%s1018_s1 + $0x120] sm:$0xff] }
  0x11   :  { %492 = vmatpush3.msra.mxu1 %v63_v27  ;;  %458 = vmatprep.subr.mxu0 %v46_v28  ;;  %v41_v48 = vld [vmem:[%s1018_s1 + $0x98] sm:$0xff]  ;;  %v40_v52 = vld [vmem:[%s1018_s1 + $0x90] sm:$0xff]  ;;  %v39_v56 = vld [vmem:[%s1018_s1 + $0x88] sm:$0xff] }
  0x12   :  { %493 = vmatprep.subr.mxu1 %v78_v29  ;;  %459 = vmatpush3.msra.mxu0 %v30_v30  ;;  %v73_v49 = vld [vmem:[%s1018_s1 + $0x198] sm:$0xff]  ;;  %v72_v53 = vld [vmem:[%s1018_s1 + $0x190] sm:$0xff]  ;;  %v71_v57 = vld [vmem:[%s1018_s1 + $0x188] sm:$0xff] }
  0x13   :  { %494 = vmatpush3.msra.mxu1 %v62_v31  ;;  %460 = vmatprep.subr.mxu0 %v45_v32  ;;  %v25_v50 = vld [vmem:[%s1018_s1 + $0x18] sm:$0xff]  ;;  %v24_v54 = vld [vmem:[%s1018_s1 + $0x10] sm:$0xff]  ;;  %v23_v58 = vld [vmem:[%s1018_s1 + $0x8] sm:$0xff] }
  0x14   :  { %495 = vmatprep.subr.mxu1 %v77_v33  ;;  %461 = vmatpush3.msra.mxu0 %v29_v34  ;;  %v57_v51 = vld [vmem:[%s1018_s1 + $0x118] sm:$0xff]  ;;  %v56_v55 = vld [vmem:[%s1018_s1 + $0x110] sm:$0xff]  ;;  %v55_v59 = vld [vmem:[%s1018_s1 + $0x108] sm:$0xff] }
  0x15   :  { %496 = vmatpush3.msra.mxu1 %v61_v35  ;;  %462 = vmatprep.subr.mxu0 %v44_v36  ;;  %v38_v60 = vld [vmem:[%s1018_s1 + $0x80] sm:$0xff]  ;;  %v15_v63 = vld [vmem:[%s1019_s0 + $0x8] sm:$0xff]  ;;  %v17_v2 = vld [vmem:[%s1019_s0 + $0x18] sm:$0xff] }
  0x16   :  { %497 = vmatprep.subr.mxu1 %v76_v37  ;;  %463 = vmatpush3.msra.mxu0 %v28_v38  ;;  %v70_v61 = vld [vmem:[%s1018_s1 + $0x180] sm:$0xff]  ;;  %v117_v3 = vld [vmem:[%s1018_s1 + $0x2f8] sm:$0xff]  ;;  %v16_v5 = vld [vmem:[%s1019_s0 + $0x10] sm:$0xff] }
  0x17   :  { %498 = vmatpush3.msra.mxu1 %v60_v39  ;;  %464 = vmatprep.subr.mxu0 %v43_v40  ;;  %v22_v62 = vld [vmem:[%s1018_s1] sm:$0xff]  ;;  %v149_v4 = vld [vmem:[%s1018_s1 + $0x3f8] sm:$0xff]  ;;  %v116_v8 = vld [vmem:[%s1018_s1 + $0x2f0] sm:$0xff] }
  0x18   :  { %499 = vmatprep.subr.mxu1 %v75_v41  ;;  %465 = vmatpush3.msra.mxu0 %v27_v42  ;;  %v54_v0 = vld [vmem:[%s1018_s1 + $0x100] sm:$0xff]  ;;  %v101_v6 = vld [vmem:[%s1018_s1 + $0x278] sm:$0xff]  ;;  %v148_v9 = vld [vmem:[%s1018_s1 + $0x3f0] sm:$0xff] }
  0x19   :  { %500 = vmatpush3.msra.mxu1 %v59_v43  ;;  %466 = vmatprep.subr.mxu0 %v42_v44  ;;  %v14_v1 = vld [vmem:[%s1019_s0] sm:$0xff]  ;;  %v133_v7 = vld [vmem:[%s1018_s1 + $0x378] sm:$0xff]  ;;  %v100_v10 = vld [vmem:[%s1018_s1 + $0x270] sm:$0xff] }
  0x1a   :  { %501 = vmatprep.subr.mxu1 %v74_v45  ;;  %467 = vmatpush3.msra.mxu0 %v26_v46  ;;  %v132_v11 = vld [vmem:[%s1018_s1 + $0x370] sm:$0xff]  ;;  %v115_v12 = vld [vmem:[%s1018_s1 + $0x2e8] sm:$0xff]  ;;  %v114_v16 = vld [vmem:[%s1018_s1 + $0x2e0] sm:$0xff] }
  0x1b   :  { %502 = vmatpush3.msra.mxu1 %v58_v47  ;;  %468 = vmatprep.subr.mxu0 %v41_v48  ;;  %v147_v13 = vld [vmem:[%s1018_s1 + $0x3e8] sm:$0xff]  ;;  %v146_v17 = vld [vmem:[%s1018_s1 + $0x3e0] sm:$0xff]  ;;  %v113_v20 = vld [vmem:[%s1018_s1 + $0x2d8] sm:$0xff] }
  0x1c   :  { %503 = vmatprep.subr.mxu1 %v73_v49  ;;  %469 = vmatpush3.msra.mxu0 %v25_v50  ;;  %v99_v14 = vld [vmem:[%s1018_s1 + $0x268] sm:$0xff]  ;;  %v98_v18 = vld [vmem:[%s1018_s1 + $0x260] sm:$0xff]  ;;  %v145_v21 = vld [vmem:[%s1018_s1 + $0x3d8] sm:$0xff] }
  0x1d   :  { %504 = vmatpush3.msra.mxu1 %v57_v51  ;;  %470 = vmatprep.subr.mxu0 %v40_v52  ;;  %v131_v15 = vld [vmem:[%s1018_s1 + $0x368] sm:$0xff]  ;;  %v130_v19 = vld [vmem:[%s1018_s1 + $0x360] sm:$0xff]  ;;  %v97_v22 = vld [vmem:[%s1018_s1 + $0x258] sm:$0xff] }
  0x1e   :  { %505 = vmatprep.subr.mxu1 %v72_v53  ;;  %471 = vmatpush3.msra.mxu0 %v24_v54  ;;  %v129_v23 = vld [vmem:[%s1018_s1 + $0x358] sm:$0xff]  ;;  %v112_v24 = vld [vmem:[%s1018_s1 + $0x2d0] sm:$0xff]  ;;  %v111_v28 = vld [vmem:[%s1018_s1 + $0x2c8] sm:$0xff] }
  0x1f   :  { %506 = vmatpush3.msra.mxu1 %v56_v55  ;;  %472 = vmatprep.subr.mxu0 %v39_v56  ;;  %v144_v25 = vld [vmem:[%s1018_s1 + $0x3d0] sm:$0xff]  ;;  %v143_v29 = vld [vmem:[%s1018_s1 + $0x3c8] sm:$0xff]  ;;  %v110_v32 = vld [vmem:[%s1018_s1 + $0x2c0] sm:$0xff] }
  0x20   :  { %507 = vmatprep.subr.mxu1 %v71_v57  ;;  %473 = vmatpush3.msra.mxu0 %v23_v58  ;;  %v96_v26 = vld [vmem:[%s1018_s1 + $0x250] sm:$0xff]  ;;  %v95_v30 = vld [vmem:[%s1018_s1 + $0x248] sm:$0xff]  ;;  %v142_v33 = vld [vmem:[%s1018_s1 + $0x3c0] sm:$0xff] }
  0x21   :  { %508 = vmatpush3.msra.mxu1 %v55_v59  ;;  %474 = vmatprep.subr.mxu0 %v38_v60  ;;  %v128_v27 = vld [vmem:[%s1018_s1 + $0x350] sm:$0xff]  ;;  %v127_v31 = vld [vmem:[%s1018_s1 + $0x348] sm:$0xff]  ;;  %v94_v34 = vld [vmem:[%s1018_s1 + $0x240] sm:$0xff] }
  0x22   :  { %509 = vmatprep.subr.mxu1 %v70_v61  ;;  %475 = vmatpush3.msra.mxu0 %v22_v62  ;;  %v126_v35 = vld [vmem:[%s1018_s1 + $0x340] sm:$0xff]  ;;  %v109_v36 = vld [vmem:[%s1018_s1 + $0x2b8] sm:$0xff]  ;;  %v108_v40 = vld [vmem:[%s1018_s1 + $0x2b0] sm:$0xff] }
  0x23   :  { %221 = vmatprep.mubr.f32.mxu0 %v15_v63  ;;  %510 = vmatpush3.msra.mxu1 %v54_v0  ;;  %v141_v37 = vld [vmem:[%s1018_s1 + $0x3b8] sm:$0xff]  ;;  %v140_v41 = vld [vmem:[%s1018_s1 + $0x3b0] sm:$0xff]  ;;  %v107_v44 = vld [vmem:[%s1018_s1 + $0x2a8] sm:$0xff] }
  0x24   :  { %222 = vmatmul.mubr.f32.vlgmr.msra.gmra.mxu0 %v14_v1  ;;  %291 = vmatprep.mubr.f32.mxu1 %v17_v2  ;;  %v93_v38 = vld [vmem:[%s1018_s1 + $0x238] sm:$0xff]  ;;  %v92_v42 = vld [vmem:[%s1018_s1 + $0x230] sm:$0xff]  ;;  %v139_v45 = vld [vmem:[%s1018_s1 + $0x3a8] sm:$0xff] }
  0x25   :  { %514 = vmatprep.subr.mxu0 %v117_v3  ;;  %549 = vmatprep.subr.mxu1 %v149_v4  ;;  %v125_v39 = vld [vmem:[%s1018_s1 + $0x338] sm:$0xff]  ;;  %v124_v43 = vld [vmem:[%s1018_s1 + $0x330] sm:$0xff]  ;;  %v91_v46 = vld [vmem:[%s1018_s1 + $0x228] sm:$0xff] }
  0x26   :  { %292 = vmatmul.mubr.f32.vlgmr.msra.gmra.mxu1 %v16_v5  ;;  %515 = vmatpush3.msra.mxu0 %v101_v6  ;;  %v123_v47 = vld [vmem:[%s1018_s1 + $0x328] sm:$0xff]  ;;  %v106_v48 = vld [vmem:[%s1018_s1 + $0x2a0] sm:$0xff]  ;;  %v105_v52 = vld [vmem:[%s1018_s1 + $0x298] sm:$0xff] }
  0x27   :  { %550 = vmatpush3.msra.mxu1 %v133_v7  ;;  %516 = vmatprep.subr.mxu0 %v116_v8  ;;  %v138_v49 = vld [vmem:[%s1018_s1 + $0x3a0] sm:$0xff]  ;;  %v137_v53 = vld [vmem:[%s1018_s1 + $0x398] sm:$0xff]  ;;  %v104_v56 = vld [vmem:[%s1018_s1 + $0x290] sm:$0xff] }
  0x28   :  { %551 = vmatprep.subr.mxu1 %v148_v9  ;;  %517 = vmatpush3.msra.mxu0 %v100_v10  ;;  %v90_v50 = vld [vmem:[%s1018_s1 + $0x220] sm:$0xff]  ;;  %v89_v54 = vld [vmem:[%s1018_s1 + $0x218] sm:$0xff]  ;;  %v136_v57 = vld [vmem:[%s1018_s1 + $0x390] sm:$0xff] }
  0x29   :  { %552 = vmatpush3.msra.mxu1 %v132_v11  ;;  %518 = vmatprep.subr.mxu0 %v115_v12  ;;  %v122_v51 = vld [vmem:[%s1018_s1 + $0x320] sm:$0xff]  ;;  %v121_v55 = vld [vmem:[%s1018_s1 + $0x318] sm:$0xff]  ;;  %v88_v58 = vld [vmem:[%s1018_s1 + $0x210] sm:$0xff] }
  0x2a   :  { %553 = vmatprep.subr.mxu1 %v147_v13  ;;  %519 = vmatpush3.msra.mxu0 %v99_v14  ;;  %v120_v59 = vld [vmem:[%s1018_s1 + $0x310] sm:$0xff]  ;;  %v103_v60 = vld [vmem:[%s1018_s1 + $0x288] sm:$0xff]  ;;  %v102_v0 = vld [vmem:[%s1018_s1 + $0x280] sm:$0xff] }
  0x2b   :  { %554 = vmatpush3.msra.mxu1 %v131_v15  ;;  %520 = vmatprep.subr.mxu0 %v114_v16  ;;  %v135_v61 = vld [vmem:[%s1018_s1 + $0x388] sm:$0xff]  ;;  %v134_v1 = vld [vmem:[%s1018_s1 + $0x380] sm:$0xff]  ;;  %v21_v5 = vld [vmem:[%s1019_s0 + $0x38] sm:$0xff] }
  0x2c   :  { %555 = vmatprep.subr.mxu1 %v146_v17  ;;  %521 = vmatpush3.msra.mxu0 %v98_v18  ;;  %v87_v62 = vld [vmem:[%s1018_s1 + $0x208] sm:$0xff]  ;;  %v86_v2 = vld [vmem:[%s1018_s1 + $0x200] sm:$0xff]  ;;  %v20_v7 = vld [vmem:[%s1019_s0 + $0x30] sm:$0xff] }
  0x2d   :  { %556 = vmatpush3.msra.mxu1 %v130_v19  ;;  %522 = vmatprep.subr.mxu0 %v113_v20  ;;  %v119_v63 = vld [vmem:[%s1018_s1 + $0x308] sm:$0xff]  ;;  %v118_v4 = vld [vmem:[%s1018_s1 + $0x300] sm:$0xff] }
  0x2e   :  { %557 = vmatprep.subr.mxu1 %v145_v21  ;;  %523 = vmatpush3.msra.mxu0 %v97_v22  ;;  %v19_v3 = vld [vmem:[%s1019_s0 + $0x28] sm:$0xff]  ;;  %v18_v6 = vld [vmem:[%s1019_s0 + $0x20] sm:$0xff] }
  0x2f   :  { %558 = vmatpush3.msra.mxu1 %v129_v23  ;;  %524 = vmatprep.subr.mxu0 %v112_v24  ;;  %v443_v12 = vld [vmem:[%s1020_s2] ss:$0 sm:$0xff] }
  0x30   :  { %559 = vmatprep.subr.mxu1 %v144_v25  ;;  %525 = vmatpush3.msra.mxu0 %v96_v26 }
  0x31   :  { %560 = vmatpush3.msra.mxu1 %v128_v27  ;;  %526 = vmatprep.subr.mxu0 %v111_v28 }
  0x32   :  { %561 = vmatprep.subr.mxu1 %v143_v29  ;;  %527 = vmatpush3.msra.mxu0 %v95_v30 }
  0x33   :  { %562 = vmatpush3.msra.mxu1 %v127_v31  ;;  %528 = vmatprep.subr.mxu0 %v110_v32 }
  0x34   :  { %563 = vmatprep.subr.mxu1 %v142_v33  ;;  %529 = vmatpush3.msra.mxu0 %v94_v34 }
  0x35   :  { %564 = vmatpush3.msra.mxu1 %v126_v35  ;;  %530 = vmatprep.subr.mxu0 %v109_v36 }
  0x36   :  { %565 = vmatprep.subr.mxu1 %v141_v37  ;;  %531 = vmatpush3.msra.mxu0 %v93_v38 }
  0x37   :  { %566 = vmatpush3.msra.mxu1 %v125_v39  ;;  %532 = vmatprep.subr.mxu0 %v108_v40 }
  0x38   :  { %567 = vmatprep.subr.mxu1 %v140_v41  ;;  %533 = vmatpush3.msra.mxu0 %v92_v42 }
  0x39   :  { %568 = vmatpush3.msra.mxu1 %v124_v43  ;;  %534 = vmatprep.subr.mxu0 %v107_v44 }
  0x3a   :  { %569 = vmatprep.subr.mxu1 %v139_v45  ;;  %535 = vmatpush3.msra.mxu0 %v91_v46 }
  0x3b   :  { %570 = vmatpush3.msra.mxu1 %v123_v47  ;;  %536 = vmatprep.subr.mxu0 %v106_v48 }
  0x3c   :  { %571 = vmatprep.subr.mxu1 %v138_v49  ;;  %537 = vmatpush3.msra.mxu0 %v90_v50 }
  0x3d   :  { %572 = vmatpush3.msra.mxu1 %v122_v51  ;;  %538 = vmatprep.subr.mxu0 %v105_v52 }
  0x3e   :  { %573 = vmatprep.subr.mxu1 %v137_v53  ;;  %539 = vmatpush3.msra.mxu0 %v89_v54 }
  0x3f   :  { %574 = vmatpush3.msra.mxu1 %v121_v55  ;;  %540 = vmatprep.subr.mxu0 %v104_v56 }
  0x40   :  { %575 = vmatprep.subr.mxu1 %v136_v57  ;;  %541 = vmatpush3.msra.mxu0 %v88_v58 }
  0x41   :  { %576 = vmatpush3.msra.mxu1 %v120_v59  ;;  %542 = vmatprep.subr.mxu0 %v103_v60 }
  0x42   :  { %577 = vmatprep.subr.mxu1 %v135_v61  ;;  %543 = vmatpush3.msra.mxu0 %v87_v62 }
  0x43   :  { %578 = vmatpush3.msra.mxu1 %v119_v63  ;;  %544 = vmatprep.subr.mxu0 %v102_v0 }
  0x44   :  { %579 = vmatprep.subr.mxu1 %v134_v1  ;;  %545 = vmatpush3.msra.mxu0 %v86_v2 }
  0x45   :  { %361 = vmatprep.mubr.f32.mxu0 %v19_v3  ;;  %580 = vmatpush3.msra.mxu1 %v118_v4 }
  0x46   :  { %431 = vmatprep.mubr.f32.mxu1 %v21_v5  ;;  %362 = vmatmul.mubr.f32.vlgmr.msra.gmra.mxu0 %v18_v6 }
  0x47   :  { %432 = vmatmul.mubr.f32.vlgmr.msra.gmra.mxu1 %v20_v7 }
  0xe4   :  { %v476_v8 = vpop.f32.mrf.mxu0 }
  0xe6   :  { %v511_v9 = vpop.f32.mrf.mxu1  ;;  %v477_v10 = vpop.f32.mrf.mxu0 }
  0xe7   :  { %v478_v11 = vadd.f32 %v477_v10, %v476_v8 }
  0xe8   :  { %v512_v13 = vpop.f32.mrf.mxu1 }
  0xe9   :  { %v224_v14 = vadd.f32 %v478_v11, %v443_v12  ;;  %v513_v15 = vadd.f32 %v512_v13, %v511_v9 }
  0xeb   :  { %v294_v20 = vadd.f32 %v513_v15, %v224_v14 }
 0x106   :  { %v546_v16 = vpop.f32.mrf.mxu0 }
 0x107   :  { %v581_v17 = vpop.f32.mrf.mxu1 }
 0x108   :  { %v547_v18 = vpop.f32.mrf.mxu0 }
 0x109   :  { %v582_v19 = vpop.f32.mrf.mxu1  ;;  %v548_v21 = vadd.f32 %v547_v18, %v546_v16 }
 0x10a   :  { %v583_v23 = vadd.f32 %v582_v19, %v581_v17 }
 0x10b   :  { %v364_v22 = vadd.f32 %v548_v21, %v294_v20 }
 0x10d   :  { %v434_v24 = vadd.f32 %v583_v23, %v364_v22 }
 0x10f   :  { %438 = vst.msk [vmem:[%s1021_s3] sm:$0xff] %vm437_vm0, %v434_v24 }

</bundles_post_ra>
